<compile_context>
chip_gen: v7x
topology: tpu7x:2x2x1
jax: 0.10.0
libtpu: 0.0.40
codegen_flags: <defaults>
</compile_context>

<pallas_src>
import jax
import jax.numpy as jnp
from jax.experimental import pallas as pl
from jax.experimental.pallas import tpu as pltpu


def lambda_layer_shortcut_a(x: jax.Array, planes: int) -> jax.Array:
    """Pallas implementation of: pad(x[:, :, ::2, ::2], channels by planes//4 each side)."""
    B, C, H, W = x.shape
    assert H % 2 == 0 and W % 2 == 0, "option-A shortcut assumes even spatial dims"
    pad = planes // 4
    C_out = C + 2 * pad
    H2, W2 = H // 2, W // 2

    # Free view: adjacent row pairs share one lane row, so the even input row is
    # the first W lanes of each (H2, 2W) row — a contiguous slice in-kernel.
    x_r = x.reshape(B, C, H2, 2 * W)

    # Exact 0/1 selection matrix for the ::2 column slice.
    sw = (jnp.arange(W)[:, None] == 2 * jnp.arange(W2)[None, :]).astype(x.dtype)  # (W, W2)

    def kernel(x_ref, sw_ref, o_ref):
        # x_ref : (1, C, H2, 2W)   one batch element, even/odd rows paired on lanes
        # sw_ref: (W, W2)          column-selection matrix (resident, fetched once)
        # o_ref : (1, C_out, H2, W2)
        if pad > 0:
            zeros = jnp.zeros((pad, H2, W2), dtype=o_ref.dtype)
            o_ref[0, :pad] = zeros          # leading zero-padded channels
            o_ref[0, pad + C:] = zeros      # trailing zero-padded channels
        sel = sw_ref[...]
        for c in range(C):                  # static unroll; C is small for CIFAR ResNets
            xe = x_ref[0, c, :, :W]         # (H2, W): even rows, contiguous lane slice
            y = jnp.dot(xe, sel, preferred_element_type=jnp.float32)  # (H2, W2): even cols
            o_ref[0, pad + c] = y.astype(o_ref.dtype)

    return pl.pallas_call(
        kernel,
        out_shape=jax.ShapeDtypeStruct((B, C_out, H2, W2), x.dtype),
        grid=(B,),
        in_specs=[
            pl.BlockSpec((1, C, H2, 2 * W), lambda b: (b, 0, 0, 0)),
            pl.BlockSpec((W, W2), lambda b: (0, 0)),
        ],
        out_specs=pl.BlockSpec((1, C_out, H2, W2), lambda b: (b, 0, 0, 0)),
        compiler_params=pltpu.CompilerParams(
            dimension_semantics=("parallel",)),
    )(x_r, sw)


if __name__ == "__main__":
    key = jax.random.PRNGKey(0)
    B, C, H, W = 2, 4, 16, 16
    planes = 2 * C  # standard option-A shortcut: channel count doubles
    x = jax.random.normal(key, (B, C, H, W), dtype=jnp.float32)

    out = lambda_layer_shortcut_a(x, planes)
    out = jax.block_until_ready(out)

    # Pure-JAX reference of the PyTorch lambda.
    pad = planes // 4
    ref = jnp.pad(x[:, :, ::2, ::2], ((0, 0), (pad, pad), (0, 0), (0, 0)))
    assert out.shape == ref.shape, (out.shape, ref.shape)
    assert jnp.allclose(out, ref, atol=0.0, rtol=0.0), "mismatch vs reference"

    print("KERNEL_OK")
</pallas_src>

<mosaic_0001>
module attributes {stable_mosaic.version = 11 : i64} {
  func.func @kernel(%arg0: i32, %arg1: memref<1x4x8x32xf32, #tpu.memory_space<vmem>>, %arg2: memref<16x8xf32, #tpu.memory_space<vmem>>, %arg3: memref<1x8x8x8xf32, #tpu.memory_space<vmem>>) attributes {dimension_semantics = [#tpu.dimension_semantics<parallel>], iteration_bounds = array<i64: 2>, scalar_prefetch = 0 : i64, scratch_operands = 0 : i64, tpu.core_type = #tpu.core_type<tc>, window_params = [{transform_indices = @transform_0, window_bounds = array<i64: 1, 4, 8, 32>}, {pipeline_mode = #tpu.pipeline_mode<synchronous>, transform_indices = @transform_1, window_bounds = array<i64: 16, 8>}, {transform_indices = @transform_2, window_bounds = array<i64: 1, 8, 8, 8>}]} {
    %cst = arith.constant 0.000000e+00 : f32
    %0 = vector.broadcast %cst : f32 to vector<2x8x8xf32>
    %c0 = arith.constant 0 : index
    %c0_0 = arith.constant 0 : index
    %c0_1 = arith.constant 0 : index
    %c0_2 = arith.constant 0 : index
    %1 = vector.load %arg3[%c0, %c0_0, %c0_1, %c0_2] : memref<1x8x8x8xf32, #tpu.memory_space<vmem>>, vector<1x2x8x8xf32>
    %2 = vector.shape_cast %1 : vector<1x2x8x8xf32> to vector<2x8x8xf32>
    %3 = vector.shape_cast %0 : vector<2x8x8xf32> to vector<1x2x8x8xf32>
    tpu.vector_store %arg3[%c0, %c0_0, %c0_1, %c0_2], %3 {strides = array<i32>} : memref<1x8x8x8xf32, #tpu.memory_space<vmem>>, vector<1x2x8x8xf32>,
    %c0_3 = arith.constant 0 : index
    %c6 = arith.constant 6 : index
    %c0_4 = arith.constant 0 : index
    %c0_5 = arith.constant 0 : index
    %4 = vector.load %arg3[%c0_3, %c6, %c0_4, %c0_5] : memref<1x8x8x8xf32, #tpu.memory_space<vmem>>, vector<1x2x8x8xf32>
    %5 = vector.shape_cast %4 : vector<1x2x8x8xf32> to vector<2x8x8xf32>
    %6 = vector.shape_cast %0 : vector<2x8x8xf32> to vector<1x2x8x8xf32>
    tpu.vector_store %arg3[%c0_3, %c6, %c0_4, %c0_5], %6 {strides = array<i32>} : memref<1x8x8x8xf32, #tpu.memory_space<vmem>>, vector<1x2x8x8xf32>,
    %c0_6 = arith.constant 0 : index
    %c0_7 = arith.constant 0 : index
    %7 = vector.load %arg2[%c0_6, %c0_7] : memref<16x8xf32, #tpu.memory_space<vmem>>, vector<16x8xf32>
    %c0_8 = arith.constant 0 : index
    %c0_9 = arith.constant 0 : index
    %c0_10 = arith.constant 0 : index
    %c0_11 = arith.constant 0 : index
    %8 = vector.load %arg1[%c0_8, %c0_9, %c0_10, %c0_11] : memref<1x4x8x32xf32, #tpu.memory_space<vmem>>, vector<1x1x8x16xf32>
    %9 = vector.shape_cast %8 : vector<1x1x8x16xf32> to vector<8x16xf32>
    %cst_12 = arith.constant dense<0.000000e+00> : vector<8x8xf32>
    %10 = tpu.matmul %9, %7, %cst_12 {dimension_numbers = #tpu.dot_dimension_numbers<[1], [0], [0], [1], [0, 0, 1, 1], [], []>} : vector<8x16xf32>, vector<16x8xf32>, vector<8x8xf32> -> vector<8x8xf32>
    %c0_13 = arith.constant 0 : index
    %c2 = arith.constant 2 : index
    %c0_14 = arith.constant 0 : index
    %c0_15 = arith.constant 0 : index
    %11 = vector.load %arg3[%c0_13, %c2, %c0_14, %c0_15] : memref<1x8x8x8xf32, #tpu.memory_space<vmem>>, vector<1x1x8x8xf32>
    %12 = vector.shape_cast %11 : vector<1x1x8x8xf32> to vector<8x8xf32>
    %13 = vector.shape_cast %10 : vector<8x8xf32> to vector<1x1x8x8xf32>
    tpu.vector_store %arg3[%c0_13, %c2, %c0_14, %c0_15], %13 {strides = array<i32>} : memref<1x8x8x8xf32, #tpu.memory_space<vmem>>, vector<1x1x8x8xf32>,
    %c0_16 = arith.constant 0 : index
    %c1 = arith.constant 1 : index
    %c0_17 = arith.constant 0 : index
    %c0_18 = arith.constant 0 : index
    %14 = vector.load %arg1[%c0_16, %c1, %c0_17, %c0_18] : memref<1x4x8x32xf32, #tpu.memory_space<vmem>>, vector<1x1x8x16xf32>
    %15 = vector.shape_cast %14 : vector<1x1x8x16xf32> to vector<8x16xf32>
    %cst_19 = arith.constant dense<0.000000e+00> : vector<8x8xf32>
    %16 = tpu.matmul %15, %7, %cst_19 {dimension_numbers = #tpu.dot_dimension_numbers<[1], [0], [0], [1], [0, 0, 1, 1], [], []>} : vector<8x16xf32>, vector<16x8xf32>, vector<8x8xf32> -> vector<8x8xf32>
    %c0_20 = arith.constant 0 : index
    %c3 = arith.constant 3 : index
    %c0_21 = arith.constant 0 : index
    %c0_22 = arith.constant 0 : index
    %17 = vector.load %arg3[%c0_20, %c3, %c0_21, %c0_22] : memref<1x8x8x8xf32, #tpu.memory_space<vmem>>, vector<1x1x8x8xf32>
    %18 = vector.shape_cast %17 : vector<1x1x8x8xf32> to vector<8x8xf32>
    %19 = vector.shape_cast %16 : vector<8x8xf32> to vector<1x1x8x8xf32>
    tpu.vector_store %arg3[%c0_20, %c3, %c0_21, %c0_22], %19 {strides = array<i32>} : memref<1x8x8x8xf32, #tpu.memory_space<vmem>>, vector<1x1x8x8xf32>,
    %c0_23 = arith.constant 0 : index
    %c2_24 = arith.constant 2 : index
    %c0_25 = arith.constant 0 : index
    %c0_26 = arith.constant 0 : index
    %20 = vector.load %arg1[%c0_23, %c2_24, %c0_25, %c0_26] : memref<1x4x8x32xf32, #tpu.memory_space<vmem>>, vector<1x1x8x16xf32>
    %21 = vector.shape_cast %20 : vector<1x1x8x16xf32> to vector<8x16xf32>
    %cst_27 = arith.constant dense<0.000000e+00> : vector<8x8xf32>
    %22 = tpu.matmul %21, %7, %cst_27 {dimension_numbers = #tpu.dot_dimension_numbers<[1], [0], [0], [1], [0, 0, 1, 1], [], []>} : vector<8x16xf32>, vector<16x8xf32>, vector<8x8xf32> -> vector<8x8xf32>
    %c0_28 = arith.constant 0 : index
    %c4 = arith.constant 4 : index
    %c0_29 = arith.constant 0 : index
    %c0_30 = arith.constant 0 : index
    %23 = vector.load %arg3[%c0_28, %c4, %c0_29, %c0_30] : memref<1x8x8x8xf32, #tpu.memory_space<vmem>>, vector<1x1x8x8xf32>
    %24 = vector.shape_cast %23 : vector<1x1x8x8xf32> to vector<8x8xf32>
    %25 = vector.shape_cast %22 : vector<8x8xf32> to vector<1x1x8x8xf32>
    tpu.vector_store %arg3[%c0_28, %c4, %c0_29, %c0_30], %25 {strides = array<i32>} : memref<1x8x8x8xf32, #tpu.memory_space<vmem>>, vector<1x1x8x8xf32>,
    %c0_31 = arith.constant 0 : index
    %c3_32 = arith.constant 3 : index
    %c0_33 = arith.constant 0 : index
    %c0_34 = arith.constant 0 : index
    %26 = vector.load %arg1[%c0_31, %c3_32, %c0_33, %c0_34] : memref<1x4x8x32xf32, #tpu.memory_space<vmem>>, vector<1x1x8x16xf32>
    %27 = vector.shape_cast %26 : vector<1x1x8x16xf32> to vector<8x16xf32>
    %cst_35 = arith.constant dense<0.000000e+00> : vector<8x8xf32>
    %28 = tpu.matmul %27, %7, %cst_35 {dimension_numbers = #tpu.dot_dimension_numbers<[1], [0], [0], [1], [0, 0, 1, 1], [], []>} : vector<8x16xf32>, vector<16x8xf32>, vector<8x8xf32> -> vector<8x8xf32>
    %c0_36 = arith.constant 0 : index
    %c5 = arith.constant 5 : index
    %c0_37 = arith.constant 0 : index
    %c0_38 = arith.constant 0 : index
    %29 = vector.load %arg3[%c0_36, %c5, %c0_37, %c0_38] : memref<1x8x8x8xf32, #tpu.memory_space<vmem>>, vector<1x1x8x8xf32>
    %30 = vector.shape_cast %29 : vector<1x1x8x8xf32> to vector<8x8xf32>
    %31 = vector.shape_cast %28 : vector<8x8xf32> to vector<1x1x8x8xf32>
    tpu.vector_store %arg3[%c0_36, %c5, %c0_37, %c0_38], %31 {strides = array<i32>} : memref<1x8x8x8xf32, #tpu.memory_space<vmem>>, vector<1x1x8x8xf32>,
    return
  }
  func.func @transform_0(%arg0: i32) -> (i32, i32, i32, i32) {
    %c0_i32 = arith.constant 0 : i32
    %c0_i32_0 = arith.constant 0 : i32
    %c0_i32_1 = arith.constant 0 : i32
    %c0_i32_2 = arith.constant 0 : i32
    return %arg0, %c0_i32, %c0_i32_0, %c0_i32_1 : i32, i32, i32, i32
  }
  func.func @transform_1(%arg0: i32) -> (i32, i32) {
    %c0_i32 = arith.constant 0 : i32
    %c0_i32_0 = arith.constant 0 : i32
    %c0_i32_1 = arith.constant 0 : i32
    return %c0_i32, %c0_i32_0 : i32, i32
  }
  func.func @transform_2(%arg0: i32) -> (i32, i32, i32, i32) {
    %c0_i32 = arith.constant 0 : i32
    %c0_i32_0 = arith.constant 0 : i32
    %c0_i32_1 = arith.constant 0 : i32
    %c0_i32_2 = arith.constant 0 : i32
    return %arg0, %c0_i32, %c0_i32_0, %c0_i32_1 : i32, i32, i32, i32
  }
}

</mosaic_0001>

<bundles_post_ra>
// kernel: tpu_custom_call.1
= control target key start
LH: loop header
LB: loop body
LE: loop exit
PB: predicated region body
PF: predicated region fallthrough
CT: control target
= control target key end

     0   :  { %7 = vsyncpa [#allocation3], 0  ;;  %s1019_s0 = inlined_call_operand.hbm [shape: f32[2,4,8,32], index: 0, kind: input, shape index: {}]   ;;  %s1020_s1 = inlined_call_operand.vmem [shape: f32[16,8], index: 1, kind: input, shape index: {}]   ;;  %s1021_s2 = inlined_call_operand.hbm [shape: f32[2,8,8,8], index: 2, kind: output, shape index: {}]  }
   0x1   :  { %9 = vsyncpa [#allocation3 + $0x1], 0 }
   0x2   :  { %10 = vsyncpa [#allocation4], 0 }
   0x3   :  { %12 = vsyncpa [#allocation4 + $0x1], 0  ;;  %s821_s9 = smov 0   ;;  %s823_s10 = smov 0  }
   0x4   :  { %s825_s11 = smov 0   ;;  %s827_s12 = smov 0  }
   0x5 LB: > { %s842_s13 = sadd.s32 4294967295, %s795_s12   ;;  %s565_s14 = sadd.s32 4294967294, %s795_s12   ;;  %s795_s12 = sphi %s827_s12, %s1034_s12   ;;  %s791_s11 = sphi %s825_s11, %s1033_s11   ;;  %s787_s10 = sphi %s823_s10, %s1032_s10   ;;  %s783_s9 = sphi %s821_s9, %s1031_s9  }
   0x6   : > { %s846_s15 = sadd.s32 1, %s795_s12   ;;  %s25_s16 = sadd.s32 1, %s791_s11 }
   0x7   : > { %s22_s17 = ssub.s32 %s795_s12, %s846_s15  ;;  %p32_p0 = scmp.ne.s32.totalorder %s791_s11, %s787_s10 }
   0x8   : > { %p23_p1 = scmp.eq.s32.totalorder %s22_s17, 0  ;;  %p33_p2 = scmp.eq.s32.totalorder %s795_s12, 0 }
   0x9   : > { %p38_p3 = scmp.ne.s32.totalorder %s787_s10, %s783_s9  ;;  %p39_p4 = scmp.eq.s32.totalorder %s842_s13, 0 }
   0xa   : > { %s858_s18 = scalar_select %p23_p1, %s791_s11, %s25_s16  }
   0xb   : > { %p860_p5 = por %p33_p2, %p32_p0  ;;  %p864_p6 = por %p39_p4, %p38_p3 }
   0xc   : > { %p83_p7 = scmp.eq.s32.totalorder %s842_s13, 1  ;;  %p89_p8 = scmp.eq.s32.totalorder %s565_s14, 1 }
   0xd   : > { %p658_p10 = scmp.lt.s32.totalorder %s795_s12, 2  ;;  %s112_s23 = sand.u32 1, %s791_s11  }
   0xe   : > { %p871_p11 = por %p83_p7, %p32_p0  ;;  %p875_p12 = por %p89_p8, %p38_p3 }
   0xf   : > { %s592_s24 = sshll.u32 %s795_s12, 9  ;;  %s568_s25 = sshll.u32 %s112_s23, 5 }
  0x10   : > { %s1025_s21 = scalar_select %p871_p11, 1, 0 }
  0x11   : > { %s1026_s22 = scalar_select %p875_p12, 1, 0 }
  0x12   : > { %s884_s28 = scalar_lea.hbm %s1019_s0, %s592_s24  ;;  %s116_s29 = scalar_lea.vmem [#allocation2], %s568_s25 }
  0x13   : > { %s123_s30 = sshll.u32 %s116_s29, 4  ;;  %p888_p13 = pnand %p658_p10, %p860_p5  ;;  %s892_s30 = int_to_ptr.vmem [resolvable:$true] %s123_s30 }
  0x14   : > { %s894_s4 = scalar_lea.sflag [#allocation3], %s112_s23  ;;  %s699_s5 = scalar_lea.hbm %s884_s28, 512 }
  0x15   : > { %p700_p0 = scmp.ne.s32.totalorder %s884_s28, %s699_s5  ;;  %p701_p1 = pneg %p888_p13 }
  0x16   : > { %s704_s8 = scalar_lea.hbm %s1019_s0, 1024  ;;  %p705_p4 = scmp.lt.u32.totalorder %s884_s28, %s1019_s0 }
  0x17   : > { %p702_p2 = pnand %p701_p1, %p700_p0  ;;  %p706_p5 = scmp.lt.u32.totalorder %s704_s8, %s699_s5 }
  0x18   : > { %p708_p8 = scmp.lt.u32.totalorder %s699_s5, %s884_s28 }
  0x19   : > { %p703_p3 = pneg %p702_p2  ;;  %p707_p7 = por %p706_p5, %p705_p4 }
  0x1b   : > { %p709_p10 = por %p708_p8, %p707_p7 }
  0x1d   : > { %p710_p9 = pnand %p709_p10, %p703_p3 }
  0x1f   : > { %713 = shalt.err (!%p710_p9)
}
  0x20   : > { %s714_s17 = scalar_lea.vmem %s892_s30, 512  ;;  %s797_s19 = smov [#allocation2]  }
  0x21   : > { %p715_p0 = scmp.ne.s32.totalorder %s892_s30, %s714_s17  ;;  %s719_s23 = sshll.u32 %s797_s19, 4  ;;  %s720_s23 = int_to_ptr.vmem [resolvable:$false] %s719_s23 }
  0x22   : > { %s721_s24 = scalar_lea.vmem %s720_s23, 1024  ;;  %p722_p11 = scmp.lt.s32.totalorder %s892_s30, %s720_s23 }
  0x23   : > { %p717_p2 = pnand %p715_p0, %p701_p1  ;;  %p723_p4 = scmp.lt.s32.totalorder %s721_s24, %s714_s17 }
  0x25   : > { %p718_p12 = pneg %p717_p2  ;;  %p724_p5 = por %p723_p4, %p722_p11 }
  0x27   : > { %p725_p7 = pnand %p724_p5, %p718_p12 }
  0x29   : > { %728 = shalt.err (!%p725_p7)
}
  0x2a   : > { %s798_s25 = smov 128   ;;  %s799_s26 = smov 8  }
  0x2b   : > { %653 = dma.hbm_to_vmem [thread:$0]  (!%p888_p13), %s884_s28, 512, %s892_s30, %s894_s4, %s798_s25, %s798_s25, %s799_s26  }
  0x2c   : > { %p571_p9 = scmp.ge.s32.totalorder %s795_s12, 1  ;;  %p131_p1 = scmp.lt.s32.totalorder %s795_s12, 3 }
  0x2e   : > { %p132_p3 = pnand %p571_p9, %p131_p1 }
  0x2f   : > { %s925_s27 = sand.u32 (!%p132_p3), 1, %s787_s10  }
  0x30   : > { %135 = sbr.rel (%p132_p3) target bundleno = 294 (0x126), region = 28  ;;  %s572_s29 = sshll.u32 (!%p132_p3), %s925_s27, 5 }
  0x31   : > { %s138_s5 = scalar_lea.sflag (!%p132_p3), [#allocation3], %s925_s27  ;;  %s929_s6 = scalar_lea.vmem (!%p132_p3), [#allocation2], %s572_s29 }
  0x37   : > { %774 = dma.done.wait (%p864_p6), %s138_s5, 512  }
  0x38   : > { %776 = vsyncadd (%p864_p6), %s138_s5, 4294966784  ;;  %s573_s28 = sshll.u32 %s925_s27, 6  ;;  %v800_v0 = vmov 0.0|0.0   ;;  %vm162_vm0 = vcmask 64512   ;;  %vm801_vm1 = vmmov 0   ;;  %v802_v1 = vmov 0.0  }
  0x39   : > { %634 = vmatprep.subr.bf16.mxu0 %v800_v0  ;;  %637 = vmatprep.subr.bf16.mxu1 %v800_v0  ;;  %s938_s30 = scalar_lea.vmem [#allocation5], %s573_s28  ;;  %v168_v2 = vld [vmem:[%s1020_s1] sm:$0xff]  ;;  %v169_v3 = vld [vmem:[%s1020_s1 + $0x8] sm:$0xff]  ;;  %vm171_vm2 = vcmask 130048   ;;  %v581_v7 = vld [vmem:[%s929_s6 + $0x10] sm:$0xff]  ;;  %s593_s14 = sshll.u32 %s842_s13, 10 }
  0x3a   : > { %610 = vmatprep.mubr.msk.f32.mxu0 %vm801_vm1, %v802_v1  ;;  %617 = vmatprep.mubr.msk.f32.mxu1 %vm801_vm1, %v802_v1  ;;  %163 = vst.msk [vmem:[%s938_s30] sm:$0xff] %vm162_vm0, %v802_v1  ;;  %164 = vst.msk [vmem:[%s938_s30 + $0x8] sm:$0xff] %vm162_vm0, %v802_v1  ;;  %v635_v4 = vpack.c.bf16 %v169_v3, %v168_v2  ;;  %v170_v5 = vld [vmem:[%s929_s6] sm:$0xff]  ;;  %v578_v6 = vld [vmem:[%s929_s6 + $0x8] sm:$0xff]  ;;  %s492_s8 = sshll.u32 %s938_s30, 4  ;;  %s971_s19 = scalar_lea.hbm %s1021_s2, %s593_s14  ;;  %s964_s8 = int_to_ptr.vmem [resolvable:$true] %s492_s8 }
  0x3b   : > { %574 = vst.msk [vmem:[%s938_s30 + $0x30] sm:$0xff] %vm162_vm0, %v802_v1  ;;  %575 = vst.msk [vmem:[%s938_s30 + $0x38] sm:$0xff] %vm162_vm0, %v802_v1  ;;  %v584_v8 = vld [vmem:[%s929_s6 + $0x18] sm:$0xff]  ;;  %s479_s13 = scalar_lea.sflag [#allocation4], %s925_s27  ;;  %s729_s23 = scalar_lea.vmem %s964_s8, 1024 }
  0x3c   : > { %636 = vmatpush3.bf16.msra.mxu0 %v635_v4  ;;  %639 = vmatpush3.bf16.msra.mxu1 %v635_v4  ;;  %p730_p6 = scmp.ne.s32.totalorder %s964_s8, %s729_s23  ;;  %p1028_p11 = scmp.ne.s32.totalorder %s1025_s21, 0 }
  0x3d   : > { %640 = vmatprep.subr.bf16.mxu0 %v800_v0  ;;  %643 = vmatprep.subr.bf16.mxu1 %v800_v0  ;;  %s803_s24 = smov [#allocation5]  }
  0x3e   : > { %p731_p12 = pnand %p730_p6, %p1028_p11  ;;  %s733_s25 = sshll.u32 %s803_s24, 4  ;;  %s734_s25 = int_to_ptr.vmem [resolvable:$false] %s733_s25 }
  0x3f   : > { %611 = vmatmul.mubr.msk.f32.vlgmr.msra.gmra.mrb[0].mxu0 %vm171_vm2, %v170_v5  ;;  %618 = vmatmul.mubr.msk.f32.vlgmr.msra.gmra.mrb[0].mxu1 %vm171_vm2, %v578_v6  ;;  %s735_s26 = scalar_lea.vmem %s734_s25, 2048  ;;  %p736_p8 = scmp.lt.s32.totalorder %s964_s8, %s734_s25 }
  0x40   : > { %642 = vmatpush3.bf16.msra.mxu0 %v635_v4  ;;  %645 = vmatpush3.bf16.msra.mxu1 %v635_v4  ;;  %p732_p13 = pneg %p731_p12  ;;  %p737_p10 = scmp.lt.s32.totalorder %s735_s26, %s729_s23 }
  0x41   : > { %624 = vmatprep.mubr.msk.f32.mxu0 %vm801_vm1, %v802_v1  ;;  %631 = vmatprep.mubr.msk.f32.mxu1 %vm801_vm1, %v802_v1 }
  0x42   : > { %p738_p0 = por %p737_p10, %p736_p8 }
  0x43   : > { %625 = vmatmul.mubr.msk.f32.vlgmr.msra.gmra.mrb[2].mxu0 %vm171_vm2, %v581_v7  ;;  %632 = vmatmul.mubr.msk.f32.vlgmr.msra.gmra.mrb[2].mxu1 %vm171_vm2, %v584_v8 }
  0x44   : > { %p739_p2 = pnand %p738_p0, %p732_p13 }
 0x112   : > { %v241_v9 = vpop.f32.mrb[0].mxu0  ;;  %v318_v10 = vpop.f32.mrb[0].mxu1 }
 0x113   : > { %577 = vst.msk [vmem:[%s938_s30 + $0x10] sm:$0xff] %vm162_vm0, %v241_v9  ;;  %580 = vst.msk [vmem:[%s938_s30 + $0x18] sm:$0xff] %vm162_vm0, %v318_v10  ;;  %v612_v11 = vpop.f32.mrb[1].mxu0  ;;  %v619_v12 = vpop.f32.mrb[1].mxu1 }
 0x116   : > { %v395_v13 = vpop.f32.mrb[2].mxu0  ;;  %v472_v14 = vpop.f32.mrb[2].mxu1 }
 0x117   : > { %583 = vst.msk [vmem:[%s938_s30 + $0x20] sm:$0xff] %vm162_vm0, %v395_v13  ;;  %586 = vst.msk [vmem:[%s938_s30 + $0x28] sm:$0xff] %vm162_vm0, %v472_v14  ;;  %v626_v15 = vpop.f32.mrb[3].mxu0  ;;  %v633_v16 = vpop.f32.mrb[3].mxu1 }
 0x118   : > { %742 = shalt.err (!%p739_p2)
}
 0x119   : > { %s743_s29 = scalar_lea.hbm %s971_s19, 1024  ;;  %s747_s28 = scalar_lea.hbm %s1021_s2, 2048 }
 0x11a   : > { %p744_p4 = scmp.ne.s32.totalorder %s971_s19, %s743_s29  ;;  %p748_p9 = scmp.lt.u32.totalorder %s971_s19, %s1021_s2 }
 0x11b   : > { %p749_p1 = scmp.lt.u32.totalorder %s747_s28, %s743_s29  ;;  %p751_p6 = scmp.lt.u32.totalorder %s743_s29, %s971_s19 }
 0x11c   : > { %p745_p5 = pnand %p744_p4, %p1028_p11 }
 0x11d   : > { %p750_p3 = por %p749_p1, %p748_p9 }
 0x11e   : > { %p746_p7 = pneg %p745_p5 }
 0x11f   : > { %p752_p12 = por %p751_p6, %p750_p3 }
 0x121   : > { %p753_p13 = pnand %p752_p12, %p746_p7 }
 0x123   : > { %756 = shalt.err (!%p753_p13)
}
 0x124   : > { %s804_s3 = smov 128   ;;  %s805_s4 = smov 8  }
 0x125   : > { %648 = dma.vmem_to_hbm [thread:$0]  (%p1028_p11), %s964_s8, 1024, %s971_s19, %s479_s13, %s804_s3, %s804_s3, %s805_s4  }
 0x126 PF: > { %s507_s7 = sand.u32 1, %s783_s9   ;;  %p1029_p8 = scmp.ne.s32.totalorder %s1026_s22, 0 }
 0x127   : > { %p1030_p10 = scmp.ge.s32.totalorder %s795_s12, 2  ;;  %s508_s14 = scalar_lea.sflag [#allocation4], %s507_s7 }
 0x129   : > { %p655_p0 = pnand %p1030_p10, %p1029_p8 }
 0x12b   : > { %778 = dma.done.wait (!%p655_p0), %s508_s14, 1024  }
 0x12c   : > { %780 = vsyncadd (!%p655_p0), %s508_s14, 4294966272  ;;  %p15_p2 = scmp.ge.s32.totalorder %s846_s15, 4   ;;  %s1031_s9 = smov %s787_s10 }
 0x12d   : > { %s1032_s10 = smov %s791_s11  ;;  %s1033_s11 = smov %s858_s18 }
 0x12e   : > { %s1034_s12 = smov %s846_s15  ;;  %17 = sbr.rel (!%p15_p2) target bundleno = 5 (0x5), region = 81 }
 0x135   :  { %513 = vsyncpa [#allocation3], 1 }
 0x136   :  { %515 = vsyncpa [#allocation3 + $0x1], 1 }
 0x137   :  { %516 = vsyncpa [#allocation4], 1 }
 0x138   :  { %518 = vsyncpa [#allocation4 + $0x1], 1 }

</bundles_post_ra>
